<compile_context>
chip_gen: v5e
topology: v5e:2x2
jax: 0.10.0
libtpu: 0.0.40
codegen_flags: <defaults>
</compile_context>

<pallas_src>
import jax
import jax.numpy as jnp
from jax.experimental import pallas as pl
from jax.experimental.pallas import tpu as pltpu

INPUT_SIZE = 784
HIDDEN_SIZE = 200
OUTPUT_SIZE = 10

# Hardware-friendly padded dims (weights only; x stays unpadded at 784)
HID_PAD = 256    # full 256-wide MXU tile on v6e/v7x
OUT_PAD = 128    # lane-dense output store (avoids vst.msk on a 10-wide output)
MAX_TB = 1024    # batch tile cap (fits comfortably under a 32 MiB scoped VMEM limit)

NEG_INF = jnp.float32(-1e30)


def _round_up(n, m):
    return (n + m - 1) // m * m


def _choose_batch_tiling(B):
    """Pick (TB, B_pad).

    - B <= MAX_TB: single tile of exactly B rows (block dim == full array dim, so no
      sublane-divisibility constraint; zero padding, zero extra copies of x).
    - Large B, multiple of 8: prefer an exact divisor of B -> no batch padding at all.
    - Otherwise: bound padded rows to ~6% of the batch.
    """
    if B <= MAX_TB:
        return B, B
    if B % 8 == 0:
        for tb in range(MAX_TB, 255, -8):
            if B % tb == 0:
                return tb, B
    B8 = _round_up(B, 8)
    for tb in range(MAX_TB, 7, -8):
        pad = _round_up(B8, tb) - B8
        if pad * 16 <= B8:          # <= ~6.25% wasted rows
            return tb, B8 + pad
    return 8, B8


def _dimension_semantics():
    """Use CORE_PARALLEL on v7x (2 TCs/chip); plain 'parallel' elsewhere."""
    core_parallel = getattr(pltpu, "CORE_PARALLEL", None)
    try:
        kind = jax.devices()[0].device_kind.lower()
    except Exception:
        kind = ""
    if core_parallel is not None and ("v7" in kind or "7x" in kind):
        return (core_parallel,)
    return ("parallel",)


def mlp_kernel(x_ref, w1_ref, b1_ref, w2_ref, b2_ref, o_ref):
    # Fused pad/cast: x arrives as the raw f32 [TB, 784] tile; cast in VMEM.
    x = x_ref[...].astype(jnp.bfloat16)
    # l1: x @ W1 + b1  (bf16 operands, f32 accumulation on the MXU)
    h = jnp.dot(x, w1_ref[...], preferred_element_type=jnp.float32)
    h = jnp.maximum(h + b1_ref[...], 0.0)          # bias broadcast + ReLU in f32 (VPU)
    # l3: h @ W2 + b2  (cast h back to bf16 for the MXU, accumulate f32)
    logits = jnp.dot(h.astype(jnp.bfloat16), w2_ref[...],
                     preferred_element_type=jnp.float32)
    logits = logits + b2_ref[...]                  # padded lanes carry -1e30 -> drop out of lse
    # log_softmax along the (padded) class dim; identical to log_softmax over the real 10
    m = jnp.max(logits, axis=1, keepdims=True)
    shifted = logits - m
    lse = jnp.log(jnp.sum(jnp.exp(shifted), axis=1, keepdims=True))
    o_ref[...] = (shifted - lse).astype(o_ref.dtype)   # bf16 store (halves write traffic)


def prepare_params(w1, b1, w2, b2):
    """One-time padding/casting of the weights. Call once, reuse across forwards."""
    w1_p = jnp.zeros((INPUT_SIZE, HID_PAD), jnp.bfloat16)
    w1_p = w1_p.at[:, :HIDDEN_SIZE].set(w1.astype(jnp.bfloat16))
    b1_p = jnp.zeros((1, HID_PAD), jnp.float32)
    b1_p = b1_p.at[:, :HIDDEN_SIZE].set(b1.reshape(1, -1).astype(jnp.float32))
    w2_p = jnp.zeros((HID_PAD, OUT_PAD), jnp.bfloat16)
    w2_p = w2_p.at[:HIDDEN_SIZE, :OUTPUT_SIZE].set(w2.astype(jnp.bfloat16))
    # Padded output lanes get a huge negative bias so they vanish in the logsumexp.
    b2_p = jnp.full((1, OUT_PAD), NEG_INF, jnp.float32)
    b2_p = b2_p.at[:, :OUTPUT_SIZE].set(b2.reshape(1, -1).astype(jnp.float32))
    return w1_p, b1_p, w2_p, b2_p


def mlp_forward(x, params):
    """x: [B, 784] f32; params: output of prepare_params. Returns [B, 10] f32 log-probs."""
    w1_p, b1_p, w2_p, b2_p = params
    B = x.shape[0]
    TB, B_pad = _choose_batch_tiling(B)
    x = x.astype(jnp.float32)
    if B_pad > B:
        x = jnp.pad(x, ((0, B_pad - B), (0, 0)))   # only when B isn't tile-aligned

    grid = (B_pad // TB,)

    def call(dim_sem):
        return pl.pallas_call(
            mlp_kernel,
            out_shape=jax.ShapeDtypeStruct((B_pad, OUT_PAD), jnp.bfloat16),
            grid_spec=pltpu.PrefetchScalarGridSpec(
                num_scalar_prefetch=0,
                grid=grid,
                in_specs=[
                    pl.BlockSpec((TB, INPUT_SIZE), lambda i: (i, 0)),     # x tiles stream (f32, unpadded)
                    pl.BlockSpec((INPUT_SIZE, HID_PAD), lambda i: (0, 0)),  # W1 resident
                    pl.BlockSpec((1, HID_PAD), lambda i: (0, 0)),           # b1 resident
                    pl.BlockSpec((HID_PAD, OUT_PAD), lambda i: (0, 0)),     # W2 resident
                    pl.BlockSpec((1, OUT_PAD), lambda i: (0, 0)),           # b2 resident
                ],
                out_specs=pl.BlockSpec((TB, OUT_PAD), lambda i: (i, 0)),
            ),
            compiler_params=pltpu.CompilerParams(
                dimension_semantics=dim_sem,
                vmem_limit_bytes=32 * 1024 * 1024,   # headroom for TB=1024 f32 x tiles on v5e
            ),
        )(x, w1_p, b1_p, w2_p, b2_p)

    primary = _dimension_semantics()
    try:
        out = call(primary)
    except Exception:
        if primary == ("parallel",):
            raise
        out = call(("parallel",))   # CORE_PARALLEL rejected -> safe fallback

    # Strip batch and class padding; return f32 log-probs.
    return out[:B, :OUTPUT_SIZE].astype(jnp.float32)


def reference_forward(x, w1, b1, w2, b2):
    h = jnp.maximum(x @ w1 + b1.reshape(1, -1), 0.0)
    logits = h @ w2 + b2.reshape(1, -1)
    return jax.nn.log_softmax(logits, axis=1)


if __name__ == "__main__":
    key = jax.random.PRNGKey(0)
    k_x, k_w1, k_b1, k_w2, k_b2 = jax.random.split(key, 5)

    B = 8  # small demo batch (MNIST rows would normally be the full csv)
    x = jax.random.uniform(k_x, (B, INPUT_SIZE), dtype=jnp.float32)  # pixels/255 -> [0,1)

    # Deterministic init mimicking nn.Linear's uniform(-1/sqrt(fan_in), 1/sqrt(fan_in))
    bound1 = 1.0 / jnp.sqrt(jnp.float32(INPUT_SIZE))
    w1 = jax.random.uniform(k_w1, (INPUT_SIZE, HIDDEN_SIZE), jnp.float32, -bound1, bound1)
    b1 = jax.random.uniform(k_b1, (HIDDEN_SIZE,), jnp.float32, -bound1, bound1)

    bound2 = 1.0 / jnp.sqrt(jnp.float32(HIDDEN_SIZE))
    w2 = jax.random.uniform(k_w2, (HIDDEN_SIZE, OUTPUT_SIZE), jnp.float32, -bound2, bound2)
    b2 = jax.random.uniform(k_b2, (OUTPUT_SIZE,), jnp.float32, -bound2, bound2)

    params = prepare_params(w1, b1, w2, b2)       # one-time weight padding/casting
    out = mlp_forward(x, params)
    out = jax.block_until_ready(out)

    ref = reference_forward(x, w1, b1, w2, b2)
    assert out.shape == (B, OUTPUT_SIZE)
    # bf16 MXU operands + bf16 output store -> loosen tolerance vs the f32 reference.
    assert jnp.allclose(out, ref, atol=5e-2, rtol=5e-2), "mismatch vs reference"
    # log_softmax sanity: probabilities over the 10 real classes sum to ~1.
    assert jnp.allclose(jnp.exp(out).sum(axis=1), 1.0, atol=2e-2), "softmax not normalized"

    print("KERNEL_OK")
</pallas_src>

<mosaic_0001>
module attributes {stable_mosaic.version = 11 : i64} {
  func.func @mlp_kernel(%arg0: i32, %arg1: memref<8x784xf32, #tpu.memory_space<vmem>>, %arg2: memref<784x256xbf16, #tpu.memory_space<vmem>>, %arg3: memref<1x256xf32, #tpu.memory_space<vmem>>, %arg4: memref<256x128xbf16, #tpu.memory_space<vmem>>, %arg5: memref<1x128xf32, #tpu.memory_space<vmem>>, %arg6: memref<8x128xbf16, #tpu.memory_space<vmem>>) attributes {dimension_semantics = [#tpu.dimension_semantics<parallel>], iteration_bounds = array<i64: 1>, scalar_prefetch = 0 : i64, scratch_operands = 0 : i64, tpu.core_type = #tpu.core_type<tc>, window_params = [{transform_indices = @transform_0, window_bounds = array<i64: 8, 784>}, {pipeline_mode = #tpu.pipeline_mode<synchronous>, transform_indices = @transform_1, window_bounds = array<i64: 784, 256>}, {pipeline_mode = #tpu.pipeline_mode<synchronous>, transform_indices = @transform_2, window_bounds = array<i64: 1, 256>}, {pipeline_mode = #tpu.pipeline_mode<synchronous>, transform_indices = @transform_3, window_bounds = array<i64: 256, 128>}, {pipeline_mode = #tpu.pipeline_mode<synchronous>, transform_indices = @transform_4, window_bounds = array<i64: 1, 128>}, {transform_indices = @transform_5, window_bounds = array<i64: 8, 128>}]} {
    %c0 = arith.constant 0 : index
    %c0_0 = arith.constant 0 : index
    %0 = vector.load %arg1[%c0, %c0_0] : memref<8x784xf32, #tpu.memory_space<vmem>>, vector<8x784xf32>
    %1 = arith.truncf %0 : vector<8x784xf32> to vector<8x784xbf16>
    %c0_1 = arith.constant 0 : index
    %c0_2 = arith.constant 0 : index
    %2 = vector.load %arg2[%c0_1, %c0_2] : memref<784x256xbf16, #tpu.memory_space<vmem>>, vector<784x256xbf16>
    %cst = arith.constant dense<0.000000e+00> : vector<8x256xf32>
    %3 = tpu.matmul %1, %2, %cst {dimension_numbers = #tpu.dot_dimension_numbers<[1], [0], [0], [1], [0, 0, 1, 1], [], []>} : vector<8x784xbf16>, vector<784x256xbf16>, vector<8x256xf32> -> vector<8x256xf32>
    %c0_3 = arith.constant 0 : index
    %c0_4 = arith.constant 0 : index
    %4 = vector.load %arg3[%c0_3, %c0_4] : memref<1x256xf32, #tpu.memory_space<vmem>>, vector<1x256xf32>
    %5 = vector.broadcast %4 : vector<1x256xf32> to vector<8x256xf32>
    %6 = arith.addf %3, %5 : vector<8x256xf32>
    %cst_5 = arith.constant 0.000000e+00 : f32
    %7 = vector.broadcast %cst_5 : f32 to vector<8x256xf32>
    %8 = arith.maximumf %6, %7 : vector<8x256xf32>
    %9 = arith.truncf %8 : vector<8x256xf32> to vector<8x256xbf16>
    %c0_6 = arith.constant 0 : index
    %c0_7 = arith.constant 0 : index
    %10 = vector.load %arg4[%c0_6, %c0_7] : memref<256x128xbf16, #tpu.memory_space<vmem>>, vector<256x128xbf16>
    %cst_8 = arith.constant dense<0.000000e+00> : vector<8x128xf32>
    %11 = tpu.matmul %9, %10, %cst_8 {dimension_numbers = #tpu.dot_dimension_numbers<[1], [0], [0], [1], [0, 0, 1, 1], [], []>} : vector<8x256xbf16>, vector<256x128xbf16>, vector<8x128xf32> -> vector<8x128xf32>
    %c0_9 = arith.constant 0 : index
    %c0_10 = arith.constant 0 : index
    %12 = vector.load %arg5[%c0_9, %c0_10] : memref<1x128xf32, #tpu.memory_space<vmem>>, vector<1x128xf32>
    %13 = vector.broadcast %12 : vector<1x128xf32> to vector<8x128xf32>
    %14 = arith.addf %11, %13 : vector<8x128xf32>
    %cst_11 = arith.constant dense<0xFF800000> : vector<8xf32>
    %15 = vector.multi_reduction <maximumf>, %14, %cst_11 [1] : vector<8x128xf32> to vector<8xf32>
    %16 = vector.shape_cast %15 : vector<8xf32> to vector<8x1xf32>
    %17 = vector.broadcast %16 : vector<8x1xf32> to vector<8x128xf32>
    %18 = arith.subf %14, %17 : vector<8x128xf32>
    %19 = math.exp %18 : vector<8x128xf32>
    %cst_12 = arith.constant dense<0.000000e+00> : vector<8xf32>
    %20 = vector.multi_reduction <add>, %19, %cst_12 [1] : vector<8x128xf32> to vector<8xf32>
    %21 = vector.shape_cast %20 : vector<8xf32> to vector<8x1xf32>
    %22 = math.log %21 : vector<8x1xf32>
    %23 = vector.broadcast %22 : vector<8x1xf32> to vector<8x128xf32>
    %24 = arith.subf %18, %23 : vector<8x128xf32>
    %25 = arith.truncf %24 : vector<8x128xf32> to vector<8x128xbf16>
    %c0_13 = arith.constant 0 : index
    %c0_14 = arith.constant 0 : index
    %26 = vector.load %arg6[%c0_13, %c0_14] : memref<8x128xbf16, #tpu.memory_space<vmem>>, vector<8x128xbf16>
    tpu.vector_store %arg6[%c0_13, %c0_14], %25 {strides = array<i32>} : memref<8x128xbf16, #tpu.memory_space<vmem>>, vector<8x128xbf16>,
    return
  }
  func.func @transform_0(%arg0: i32) -> (i32, i32) {
    %c0_i32 = arith.constant 0 : i32
    %c0_i32_0 = arith.constant 0 : i32
    return %arg0, %c0_i32 : i32, i32
  }
  func.func @transform_1(%arg0: i32) -> (i32, i32) {
    %c0_i32 = arith.constant 0 : i32
    %c0_i32_0 = arith.constant 0 : i32
    %c0_i32_1 = arith.constant 0 : i32
    return %c0_i32, %c0_i32_0 : i32, i32
  }
  func.func @transform_2(%arg0: i32) -> (i32, i32) {
    %c0_i32 = arith.constant 0 : i32
    %c0_i32_0 = arith.constant 0 : i32
    %c0_i32_1 = arith.constant 0 : i32
    return %c0_i32, %c0_i32_0 : i32, i32
  }
  func.func @transform_3(%arg0: i32) -> (i32, i32) {
    %c0_i32 = arith.constant 0 : i32
    %c0_i32_0 = arith.constant 0 : i32
    %c0_i32_1 = arith.constant 0 : i32
    return %c0_i32, %c0_i32_0 : i32, i32
  }
  func.func @transform_4(%arg0: i32) -> (i32, i32) {
    %c0_i32 = arith.constant 0 : i32
    %c0_i32_0 = arith.constant 0 : i32
    %c0_i32_1 = arith.constant 0 : i32
    return %c0_i32, %c0_i32_0 : i32, i32
  }
  func.func @transform_5(%arg0: i32) -> (i32, i32) {
    %c0_i32 = arith.constant 0 : i32
    %c0_i32_0 = arith.constant 0 : i32
    return %arg0, %c0_i32 : i32, i32
  }
}

</mosaic_0001>

<bundles_post_ra>
// kernel: tpu_custom_call.1
= control target key start
LH: loop header
LB: loop body
LE: loop exit
PB: predicated region body
PF: predicated region fallthrough
CT: control target
= control target key end

     0   :  { %10 = vsyncpa [#allocation3], 0  ;;  %s1869_s0 = inlined_call_operand.hbm [shape: f32[8,784], index: 0, kind: input, shape index: {}]   ;;  %s1870_s1 = inlined_call_operand.hbm [shape: bf16[784,256], index: 1, kind: input, shape index: {}]   ;;  %s1871_s2 = inlined_call_operand.hbm [shape: f32[1,256], index: 2, kind: input, shape index: {}]   ;;  %s1872_s3 = inlined_call_operand.hbm [shape: bf16[256,128], index: 3, kind: input, shape index: {}]   ;;  %s1873_s4 = inlined_call_operand.vmem [shape: f32[1,128], index: 4, kind: input, shape index: {}]   ;;  %s1874_s5 = inlined_call_operand.hbm [shape: bf16[8,128], index: 5, kind: output, shape index: {}]  }
   0x1   :  { %11 = vsyncpa [#allocation6], 0 }
   0x2   :  { %12 = vsyncpa [#allocation9], 0  ;;  %s29_s20 = sshll.u32 %s1870_s1, 4  ;;  %s30_s20 = int_to_ptr.hbm [resolvable:$true] %s29_s20 }
   0x3   :  { %13 = vsyncpa [#allocation4], 0  ;;  %s1782_s21 = smov [#allocation5]   ;;  %s19_s25 = sshll.u32 %s1869_s0, 4  ;;  %s20_s25 = int_to_ptr.hbm [resolvable:$true] %s19_s25 }
   0x4   :  { %s31_s22 = sshll.u32 %s1782_s21, 4  ;;  %s1783_s26 = smov 128   ;;  %s32_s22 = int_to_ptr.vmem [resolvable:$true] %s31_s22 }
   0x5   :  { %s1784_s27 = smov 8   ;;  %s1785_s28 = smov [#allocation2]  }
   0x6   :  { %37 = dma.hbm_to_vmem [thread:$0]  %s30_s20, 12544, %s32_s22, [#allocation6], %s1783_s26, %s1783_s26, %s1784_s27  }
   0x7   :  { %s21_s29 = sshll.u32 %s1785_s28, 4  ;;  %s43_s7 = sshll.u32 %s1871_s2, 4  ;;  %s22_s29 = int_to_ptr.vmem [resolvable:$true] %s21_s29  ;;  %s44_s7 = int_to_ptr.hbm [resolvable:$true] %s43_s7 }
   0x8   :  { %24 = dma.hbm_to_vmem [thread:$0]  %s20_s25, 896, %s22_s29, [#allocation3]  }
   0x9   :  { %s53_s9 = sshll.u32 %s1872_s3, 4  ;;  %s1786_s10 = smov [#allocation7]   ;;  %s54_s9 = int_to_ptr.hbm [resolvable:$true] %s53_s9 }
   0xa   :  { %s45_s11 = sshll.u32 %s1786_s10, 4  ;;  %s1787_s0 = smov [#allocation8]   ;;  %s46_s11 = int_to_ptr.vmem [resolvable:$true] %s45_s11 }
   0xb   :  { %48 = dma.hbm_to_vmem [thread:$0]  %s44_s7, 32, %s46_s11, [#allocation6]  }
   0xc   :  { %s55_s12 = sshll.u32 %s1787_s0, 4  ;;  %s1788_s13 = smov 64   ;;  %s56_s12 = int_to_ptr.vmem [resolvable:$true] %s55_s12 }
   0xd   :  { %s1789_s14 = smov 4  }
   0xe   :  { %61 = dma.hbm_to_vmem [thread:$0]  %s54_s9, 2048, %s56_s12, [#allocation9], %s1788_s13, %s1788_s13, %s1789_s14  }
   0xf   :  { %1774 = dma.done.wait [#allocation3], 896  }
  0x10   :  { %1775 = vsyncadd [#allocation3], 4294966400 }
  0x11   :  { %1776 = dma.done.wait [#allocation6], 12576  }
  0x12   :  { %1777 = vsyncadd [#allocation6], 4294954720 }
  0x13   :  { %1778 = dma.done.wait [#allocation9], 2048  }
  0x14   :  { %1779 = vsyncadd [#allocation9], 4294965248  ;;  %v1126_v0 = vld [vmem:[#allocation5 + $0x70] sm:$0xf]  ;;  %v1541_v1 = vld [vmem:[#allocation5 + $0x74] sm:$0xf0] }
  0x15   :  { %v1254_v2 = vld [vmem:[#allocation5 + $0x170] sm:$0xf]  ;;  %v1127_v3 = vor.u32 %v1541_v1, %v1126_v0  ;;  %v1573_v4 = vld [vmem:[#allocation5 + $0x174] sm:$0xf0]  ;;  %v1118_v11 = vld [vmem:[#allocation5 + $0x60] sm:$0xf] }
  0x16   :  { %v1318_v5 = vld [vmem:[#allocation5 + $0x1f0] sm:$0xf]  ;;  %v1589_v6 = vld [vmem:[#allocation5 + $0x1f4] sm:$0xf0]  ;;  %v1255_v7 = vor.u32 %v1573_v4, %v1254_v2  ;;  %v1539_v13 = vld [vmem:[#allocation5 + $0x64] sm:$0xf0] }
  0x17   :  { %v1319_v8 = vor.u32 %v1589_v6, %v1318_v5  ;;  %v1190_v9 = vld [vmem:[#allocation5 + $0xf0] sm:$0xf]  ;;  %v1557_v10 = vld [vmem:[#allocation5 + $0xf4] sm:$0xf0]  ;;  %693 = vmatpush.bf16.msra.mxu0 %v1127_v3  ;;  %v1246_v14 = vld [vmem:[#allocation5 + $0x160] sm:$0xf]  ;;  %v1119_v16 = vor.u32 %v1539_v13, %v1118_v11 }
  0x18   :  { %v1191_v12 = vor.u32 %v1557_v10, %v1190_v9  ;;  %v1571_v15 = vld [vmem:[#allocation5 + $0x164] sm:$0xf0]  ;;  %719 = vmatpush.bf16.msra.mxu2 %v1255_v7  ;;  %v1310_v18 = vld [vmem:[#allocation5 + $0x1e0] sm:$0xf]  ;;  %v1110_v23 = vld [vmem:[#allocation5 + $0x50] sm:$0xf] }
  0x19   :  { %732 = vmatpush.bf16.msra.mxu3 %v1319_v8  ;;  %v1247_v17 = vor.u32 %v1571_v15, %v1246_v14  ;;  %v1587_v19 = vld [vmem:[#allocation5 + $0x1e4] sm:$0xf0]  ;;  %v1182_v20 = vld [vmem:[#allocation5 + $0xe0] sm:$0xf]  ;;  %v1537_v24 = vld [vmem:[#allocation5 + $0x54] sm:$0xf0] }
  0x1a   :  { %706 = vmatpush.bf16.msra.mxu1 %v1191_v12  ;;  %v1311_v21 = vor.u32 %v1587_v19, %v1310_v18  ;;  %v1555_v22 = vld [vmem:[#allocation5 + $0xe4] sm:$0xf0]  ;;  %v1238_v26 = vld [vmem:[#allocation5 + $0x150] sm:$0xf]  ;;  %v1569_v27 = vld [vmem:[#allocation5 + $0x154] sm:$0xf0]  ;;  %v1111_v29 = vor.u32 %v1537_v24, %v1110_v23 }
  0x1b   :  { %v1183_v25 = vor.u32 %v1555_v22, %v1182_v20  ;;  %v1302_v28 = vld [vmem:[#allocation5 + $0x1d0] sm:$0xf]  ;;  %694 = vmatpush.bf16.msra.mxu0 %v1119_v16  ;;  %v1585_v30 = vld [vmem:[#allocation5 + $0x1d4] sm:$0xf0]  ;;  %v1239_v33 = vor.u32 %v1569_v27, %v1238_v26  ;;  %v1102_v35 = vld [vmem:[#allocation5 + $0x40] sm:$0xf] }
  0x1c   :  { %v1174_v31 = vld [vmem:[#allocation5 + $0xd0] sm:$0xf]  ;;  %v1553_v32 = vld [vmem:[#allocation5 + $0xd4] sm:$0xf0]  ;;  %720 = vmatpush.bf16.msra.mxu2 %v1247_v17  ;;  %v1303_v34 = vor.u32 %v1585_v30, %v1302_v28  ;;  %v1535_v36 = vld [vmem:[#allocation5 + $0x44] sm:$0xf0] }
  0x1d   :  { %733 = vmatpush.bf16.msra.mxu3 %v1311_v21  ;;  %v1230_v37 = vld [vmem:[#allocation5 + $0x140] sm:$0xf]  ;;  %v1175_v38 = vor.u32 %v1553_v32, %v1174_v31  ;;  %v1567_v39 = vld [vmem:[#allocation5 + $0x144] sm:$0xf0]  ;;  %v1103_v44 = vor.u32 %v1535_v36, %v1102_v35  ;;  %v1094_v47 = vld [vmem:[#allocation5 + $0x30] sm:$0xf] }
  0x1e   :  { %707 = vmatpush.bf16.msra.mxu1 %v1183_v25  ;;  %v1294_v40 = vld [vmem:[#allocation5 + $0x1c0] sm:$0xf]  ;;  %v1583_v41 = vld [vmem:[#allocation5 + $0x1c4] sm:$0xf0]  ;;  %v1231_v45 = vor.u32 %v1567_v39, %v1230_v37  ;;  %v1533_v48 = vld [vmem:[#allocation5 + $0x34] sm:$0xf0] }
  0x1f   :  { %v1166_v42 = vld [vmem:[#allocation5 + $0xc0] sm:$0xf]  ;;  %v1551_v43 = vld [vmem:[#allocation5 + $0xc4] sm:$0xf0]  ;;  %695 = vmatpush.bf16.msra.mxu0 %v1111_v29  ;;  %v1295_v46 = vor.u32 %v1583_v41, %v1294_v40  ;;  %v1222_v49 = vld [vmem:[#allocation5 + $0x130] sm:$0xf]  ;;  %v1095_v56 = vor.u32 %v1533_v48, %v1094_v47 }
  0x20   :  { %721 = vmatpush.bf16.msra.mxu2 %v1239_v33  ;;  %v1167_v50 = vor.u32 %v1551_v43, %v1166_v42  ;;  %v1565_v51 = vld [vmem:[#allocation5 + $0x134] sm:$0xf0]  ;;  %v1286_v52 = vld [vmem:[#allocation5 + $0x1b0] sm:$0xf]  ;;  %v1086_v59 = vld [vmem:[#allocation5 + $0x20] sm:$0xf] }
  0x21   :  { %734 = vmatpush.bf16.msra.mxu3 %v1303_v34  ;;  %v1581_v53 = vld [vmem:[#allocation5 + $0x1b4] sm:$0xf0]  ;;  %v1158_v54 = vld [vmem:[#allocation5 + $0xb0] sm:$0xf]  ;;  %v1223_v57 = vor.u32 %v1565_v51, %v1222_v49  ;;  %v1531_v60 = vld [vmem:[#allocation5 + $0x24] sm:$0xf0] }
  0x22   :  { %708 = vmatpush.bf16.msra.mxu1 %v1175_v38  ;;  %v1549_v55 = vld [vmem:[#allocation5 + $0xb4] sm:$0xf0]  ;;  %v1287_v58 = vor.u32 %v1581_v53, %v1286_v52  ;;  %v1214_v61 = vld [vmem:[#allocation5 + $0x120] sm:$0xf]  ;;  %v1563_v63 = vld [vmem:[#allocation5 + $0x124] sm:$0xf0]  ;;  %v1087_v4 = vor.u32 %v1531_v60, %v1086_v59 }
  0x23   :  { %696 = vmatpush.bf16.msra.mxu0 %v1103_v44  ;;  %v1159_v62 = vor.u32 %v1549_v55, %v1158_v54  ;;  %v1278_v0 = vld [vmem:[#allocation5 + $0x1a0] sm:$0xf]  ;;  %v1579_v1 = vld [vmem:[#allocation5 + $0x1a4] sm:$0xf0]  ;;  %v1215_v5 = vor.u32 %v1563_v63, %v1214_v61  ;;  %v1078_v7 = vld [vmem:[#allocation5 + $0x10] sm:$0xf] }
  0x24   :  { %722 = vmatpush.bf16.msra.mxu2 %v1231_v45  ;;  %v1150_v2 = vld [vmem:[#allocation5 + $0xa0] sm:$0xf]  ;;  %v1547_v3 = vld [vmem:[#allocation5 + $0xa4] sm:$0xf0]  ;;  %v1279_v6 = vor.u32 %v1579_v1, %v1278_v0  ;;  %v1529_v8 = vld [vmem:[#allocation5 + $0x14] sm:$0xf0] }
  0x25   :  { %735 = vmatpush.bf16.msra.mxu3 %v1295_v46  ;;  %v1206_v9 = vld [vmem:[#allocation5 + $0x110] sm:$0xf]  ;;  %v1151_v10 = vor.u32 %v1547_v3, %v1150_v2  ;;  %v1561_v11 = vld [vmem:[#allocation5 + $0x114] sm:$0xf0]  ;;  %v1079_v16 = vor.u32 %v1529_v8, %v1078_v7  ;;  %v1070_v17 = vld [vmem:[#allocation5] sm:$0xf] }
  0x26   :  { %709 = vmatpush.bf16.msra.mxu1 %v1167_v50  ;;  %v1270_v12 = vld [vmem:[#allocation5 + $0x190] sm:$0xf]  ;;  %v1577_v13 = vld [vmem:[#allocation5 + $0x194] sm:$0xf0]  ;;  %v1527_v18 = vld [vmem:[#allocation5 + $0x4] sm:$0xf0]  ;;  %v1207_v20 = vor.u32 %v1561_v11, %v1206_v9 }
  0x27   :  { %697 = vmatpush.bf16.msra.mxu0 %v1095_v56  ;;  %v1142_v14 = vld [vmem:[#allocation5 + $0x90] sm:$0xf]  ;;  %v1545_v15 = vld [vmem:[#allocation5 + $0x94] sm:$0xf0]  ;;  %v1198_v19 = vld [vmem:[#allocation5 + $0x100] sm:$0xf]  ;;  %v1271_v21 = vor.u32 %v1577_v13, %v1270_v12  ;;  %v1071_v32 = vor.u32 %v1527_v18, %v1070_v17 }
  0x28   :  { %723 = vmatpush.bf16.msra.mxu2 %v1223_v57  ;;  %v1559_v22 = vld [vmem:[#allocation5 + $0x104] sm:$0xf0]  ;;  %v1262_v23 = vld [vmem:[#allocation5 + $0x180] sm:$0xf]  ;;  %v1143_v25 = vor.u32 %v1545_v15, %v1142_v14  ;;  %v1382_v26 = vld [vmem:[#allocation5 + $0x270] sm:$0xf] }
  0x29   :  { %736 = vmatpush.bf16.msra.mxu3 %v1287_v58  ;;  %v1575_v24 = vld [vmem:[#allocation5 + $0x184] sm:$0xf0]  ;;  %v1605_v27 = vld [vmem:[#allocation5 + $0x274] sm:$0xf0]  ;;  %v1540_v28 = vld [vmem:[#allocation5 + $0x74] sm:$0xf]  ;;  %v1199_v36 = vor.u32 %v1559_v22, %v1198_v19 }
  0x2a   :  { %710 = vmatpush.bf16.msra.mxu1 %v1159_v62  ;;  %v1128_v29 = vld [vmem:[#allocation5 + $0x78] sm:$0xf0]  ;;  %v1134_v30 = vld [vmem:[#allocation5 + $0x80] sm:$0xf]  ;;  %v1543_v31 = vld [vmem:[#allocation5 + $0x84] sm:$0xf0]  ;;  %v1263_v37 = vor.u32 %v1575_v24, %v1262_v23  ;;  %v1383_v41 = vor.u32 %v1605_v27, %v1382_v26 }
  0x2b   :  { %698 = vmatpush.bf16.msra.mxu0 %v1087_v4  ;;  %v83_v33 = vld [vmem:[#allocation2 + $0x10] sm:$0xff]  ;;  %v1454_v34 = vld [vmem:[#allocation5 + $0x300] sm:$0xf]  ;;  %v1623_v35 = vld [vmem:[#allocation5 + $0x304] sm:$0xf0]  ;;  %v1131_v42 = vor.u32 %v1540_v28, %v1128_v29  ;;  %v1135_v46 = vor.u32 %v1543_v31, %v1134_v30  ;;  %vm689_vm0 = vcmask 130048  }
  0x2c   :  { %724 = vmatpush.bf16.msra.mxu2 %v1215_v5  ;;  %v1446_v38 = vld [vmem:[#allocation5 + $0x2f0] sm:$0xf]  ;;  %v1621_v39 = vld [vmem:[#allocation5 + $0x2f4] sm:$0xf0]  ;;  %v1556_v40 = vld [vmem:[#allocation5 + $0xf4] sm:$0xf]  ;;  %v1455_v47 = vor.u32 %v1623_v35, %v1454_v34  ;;  %v1833_v51 = vpack.c.bf16 %v83_v33, %v83_v33 }
  0x2d   :  { %737 = vmatpush.bf16.msra.mxu3 %v1279_v6  ;;  %v1192_v43 = vld [vmem:[#allocation5 + $0xf8] sm:$0xf0]  ;;  %v1374_v44 = vld [vmem:[#allocation5 + $0x260] sm:$0xf]  ;;  %v81_v45 = vld [vmem:[#allocation2] sm:$0xff]  ;;  %v1447_v52 = vor.u32 %v1621_v39, %v1446_v38  ;;  %s1790_s15 = smov [#allocation10]  }
  0x2e   :  { %711 = vmatpush.bf16.msra.mxu1 %v1151_v10  ;;  %v1603_v48 = vld [vmem:[#allocation5 + $0x264] sm:$0xf0]  ;;  %v1538_v49 = vld [vmem:[#allocation5 + $0x64] sm:$0xf]  ;;  %v1120_v50 = vld [vmem:[#allocation5 + $0x68] sm:$0xf0]  ;;  %v1195_v55 = vor.u32 %v1556_v40, %v1192_v43  ;;  %v1835_v58 = vpack.c.bf16 %v81_v45, %v81_v45 }
  0x2f   :  { %699 = vmatpush.bf16.msra.mxu0 %v1079_v16  ;;  %v84_v53 = vld [vmem:[#allocation2 + $0x18] sm:$0xff]  ;;  %v82_v54 = vld [vmem:[#allocation2 + $0x8] sm:$0xff]  ;;  %v1619_v57 = vld [vmem:[#allocation5 + $0x2e4] sm:$0xf0]  ;;  %v1375_v59 = vor.u32 %v1603_v48, %v1374_v44  ;;  %v1123_v60 = vor.u32 %v1538_v49, %v1120_v50  ;;  %s1054_s16 = sshll.u32 %s1790_s15, 4  ;;  %s1055_s16 = int_to_ptr.vmem [resolvable:$true] %s1054_s16 }
  0x30   :  { %725 = vmatpush.bf16.msra.mxu2 %v1207_v20  ;;  %v1438_v56 = vld [vmem:[#allocation5 + $0x2e0] sm:$0xf]  ;;  %v1554_v61 = vld [vmem:[#allocation5 + $0xe4] sm:$0xf]  ;;  %v1184_v62 = vld [vmem:[#allocation5 + $0xe8] sm:$0xf0]  ;;  %v1837_v3 = vpack.c.bf16 %v84_v53, %v84_v53  ;;  %v1839_v4 = vpack.c.bf16 %v82_v54, %v82_v54 }
  0x31   :  { %738 = vmatpush.bf16.msra.mxu3 %v1271_v21  ;;  %v1366_v63 = vld [vmem:[#allocation5 + $0x250] sm:$0xf]  ;;  %v1601_v0 = vld [vmem:[#allocation5 + $0x254] sm:$0xf0]  ;;  %v1536_v1 = vld [vmem:[#allocation5 + $0x54] sm:$0xf]  ;;  %v1439_v5 = vor.u32 %v1619_v57, %v1438_v56  ;;  %v1187_v6 = vor.u32 %v1554_v61, %v1184_v62 }
  0x32   :  { %712 = vmatpush.bf16.msra.mxu1 %v1143_v25  ;;  %v1112_v2 = vld [vmem:[#allocation5 + $0x58] sm:$0xf0]  ;;  %v1430_v7 = vld [vmem:[#allocation5 + $0x2d0] sm:$0xf]  ;;  %v1617_v8 = vld [vmem:[#allocation5 + $0x2d4] sm:$0xf0]  ;;  %v1367_v9 = vor.u32 %v1601_v0, %v1366_v63 }
  0x33   :  { %700 = vmatpush.bf16.msra.mxu0 %v1071_v32  ;;  %v1115_v10 = vor.u32 %v1536_v1, %v1112_v2  ;;  %v1552_v11 = vld [vmem:[#allocation5 + $0xd4] sm:$0xf]  ;;  %v1176_v12 = vld [vmem:[#allocation5 + $0xd8] sm:$0xf0]  ;;  %v1358_v13 = vld [vmem:[#allocation5 + $0x240] sm:$0xf]  ;;  %v1431_v17 = vor.u32 %v1617_v8, %v1430_v7 }
  0x34   :  { %726 = vmatpush.bf16.msra.mxu2 %v1199_v36  ;;  %v1599_v14 = vld [vmem:[#allocation5 + $0x244] sm:$0xf0]  ;;  %v1534_v15 = vld [vmem:[#allocation5 + $0x44] sm:$0xf]  ;;  %v1104_v16 = vld [vmem:[#allocation5 + $0x48] sm:$0xf0]  ;;  %v1179_v18 = vor.u32 %v1552_v11, %v1176_v12 }
  0x35   :  { %739 = vmatpush.bf16.msra.mxu3 %v1263_v37  ;;  %v1422_v19 = vld [vmem:[#allocation5 + $0x2c0] sm:$0xf]  ;;  %v1615_v20 = vld [vmem:[#allocation5 + $0x2c4] sm:$0xf0]  ;;  %v1359_v21 = vor.u32 %v1599_v14, %v1358_v13  ;;  %v1107_v22 = vor.u32 %v1534_v15, %v1104_v16  ;;  %v1550_v23 = vld [vmem:[#allocation5 + $0xc4] sm:$0xf] }
  0x36   :  { %713 = vmatpush.bf16.msra.mxu1 %v1135_v46  ;;  %701 = vmatmul.bf16.vlgmr.msra.gmra.mxu0 %v1835_v58  ;;  %v1168_v24 = vld [vmem:[#allocation5 + $0xc8] sm:$0xf0]  ;;  %v1350_v25 = vld [vmem:[#allocation5 + $0x230] sm:$0xf]  ;;  %v1597_v26 = vld [vmem:[#allocation5 + $0x234] sm:$0xf0]  ;;  %v1423_v29 = vor.u32 %v1615_v20, %v1422_v19 }
  0x37   :  { %745 = vmatpush.bf16.msrb.mxu0 %v1383_v41  ;;  %727 = vmatmul.bf16.vlgmr.msra.gmra.mxu2 %v1833_v51  ;;  %v1532_v27 = vld [vmem:[#allocation5 + $0x34] sm:$0xf]  ;;  %v1096_v28 = vld [vmem:[#allocation5 + $0x38] sm:$0xf0]  ;;  %v1171_v30 = vor.u32 %v1550_v23, %v1168_v24  ;;  %v1414_v31 = vld [vmem:[#allocation5 + $0x2b0] sm:$0xf]  ;;  %v1351_v34 = vor.u32 %v1597_v26, %v1350_v25 }
  0x38   :  { %778 = vmatpush.bf16.msrb.mxu2 %v1455_v47  ;;  %740 = vmatmul.bf16.vlgmr.msra.gmra.mxu3 %v1837_v3  ;;  %v1613_v32 = vld [vmem:[#allocation5 + $0x2b4] sm:$0xf0]  ;;  %v1099_v35 = vor.u32 %v1532_v27, %v1096_v28  ;;  %v1548_v36 = vld [vmem:[#allocation5 + $0xb4] sm:$0xf]  ;;  %v1160_v37 = vld [vmem:[#allocation5 + $0xb8] sm:$0xf0] }
  0x39   :  { %784 = vmatpush.bf16.msrb.mxu3 %v1131_v42  ;;  %714 = vmatmul.bf16.vlgmr.msra.gmra.mxu1 %v1839_v4  ;;  %v87_v33 = vld [vmem:[#allocation2 + $0x30] sm:$0xff]  ;;  %v1342_v38 = vld [vmem:[#allocation5 + $0x220] sm:$0xf]  ;;  %v1595_v39 = vld [vmem:[#allocation5 + $0x224] sm:$0xf0]  ;;  %v1415_v42 = vor.u32 %v1613_v32, %v1414_v31  ;;  %v1163_v44 = vor.u32 %v1548_v36, %v1160_v37 }
  0x3a   :  { %758 = vmatpush.bf16.msrb.mxu1 %v1447_v52  ;;  %v1530_v40 = vld [vmem:[#allocation5 + $0x24] sm:$0xf]  ;;  %v1088_v41 = vld [vmem:[#allocation5 + $0x28] sm:$0xf0]  ;;  %v1845_v43 = vpack.c.bf16 %v87_v33, %v87_v33  ;;  %v1406_v45 = vld [vmem:[#allocation5 + $0x2a0] sm:$0xf]  ;;  %v1343_v47 = vor.u32 %v1595_v39, %v1342_v38 }
  0x3b   :  { %746 = vmatpush.bf16.msrb.mxu0 %v1375_v59  ;;  %v1611_v46 = vld [vmem:[#allocation5 + $0x2a4] sm:$0xf0]  ;;  %v1091_v48 = vor.u32 %v1530_v40, %v1088_v41  ;;  %v1546_v49 = vld [vmem:[#allocation5 + $0xa4] sm:$0xf]  ;;  %v1152_v50 = vld [vmem:[#allocation5 + $0xa8] sm:$0xf0] }
  0x3c   :  { %797 = vmatpush.bf16.msra.mxu2 %v1195_v55  ;;  %v1334_v52 = vld [vmem:[#allocation5 + $0x210] sm:$0xf]  ;;  %v1593_v53 = vld [vmem:[#allocation5 + $0x214] sm:$0xf0]  ;;  %v1528_v54 = vld [vmem:[#allocation5 + $0x14] sm:$0xf]  ;;  %v1407_v56 = vor.u32 %v1611_v46, %v1406_v45  ;;  %v1155_v57 = vor.u32 %v1546_v49, %v1152_v50 }
  0x3d   :  { %785 = vmatpush.bf16.msrb.mxu3 %v1123_v60  ;;  %v1080_v55 = vld [vmem:[#allocation5 + $0x18] sm:$0xf0]  ;;  %v1398_v59 = vld [vmem:[#allocation5 + $0x290] sm:$0xf]  ;;  %v1609_v60 = vld [vmem:[#allocation5 + $0x294] sm:$0xf0]  ;;  %v1335_v62 = vor.u32 %v1593_v53, %v1334_v52 }
  0x3e   :  { %759 = vmatpush.bf16.msrb.mxu1 %v1439_v5  ;;  %v1544_v61 = vld [vmem:[#allocation5 + $0x94] sm:$0xf]  ;;  %v1083_v63 = vor.u32 %v1528_v54, %v1080_v55  ;;  %v1144_v0 = vld [vmem:[#allocation5 + $0x98] sm:$0xf0]  ;;  %v1326_v1 = vld [vmem:[#allocation5 + $0x200] sm:$0xf]  ;;  %v1399_v8 = vor.u32 %v1609_v60, %v1398_v59 }
  0x3f   :  { %747 = vmatpush.bf16.msrb.mxu0 %v1367_v9  ;;  %v1591_v2 = vld [vmem:[#allocation5 + $0x204] sm:$0xf0]  ;;  %v1526_v5 = vld [vmem:[#allocation5 + $0x4] sm:$0xf]  ;;  %v1572_v7 = vld [vmem:[#allocation5 + $0x174] sm:$0xf]  ;;  %v1147_v12 = vor.u32 %v1544_v61, %v1144_v0 }
  0x40   :  { %798 = vmatpush.bf16.msra.mxu2 %v1187_v6  ;;  %v1072_v6 = vld [vmem:[#allocation5 + $0x8] sm:$0xf0]  ;;  %v1256_v9 = vld [vmem:[#allocation5 + $0x178] sm:$0xf0]  ;;  %v1390_v13 = vld [vmem:[#allocation5 + $0x280] sm:$0xf]  ;;  %v1327_v16 = vor.u32 %v1591_v2, %v1326_v1 }
  0x41   :  { %786 = vmatpush.bf16.msrb.mxu3 %v1115_v10  ;;  %v1604_v10 = vld [vmem:[#allocation5 + $0x274] sm:$0xf]  ;;  %v1384_v11 = vld [vmem:[#allocation5 + $0x278] sm:$0xf0]  ;;  %v1607_v14 = vld [vmem:[#allocation5 + $0x284] sm:$0xf0] }
  0x42   :  { %760 = vmatpush.bf16.msrb.mxu1 %v1431_v17  ;;  %v85_v15 = vld [vmem:[#allocation2 + $0x20] sm:$0xff]  ;;  %v1075_v17 = vor.u32 %v1526_v5, %v1072_v6  ;;  %v1588_v20 = vld [vmem:[#allocation5 + $0x1f4] sm:$0xf]  ;;  %v1320_v23 = vld [vmem:[#allocation5 + $0x1f8] sm:$0xf0]  ;;  %v1391_v26 = vor.u32 %v1607_v14, %v1390_v13 }
  0x43   :  { %748 = vmatpush.bf16.msrb.mxu0 %v1359_v21  ;;  %v1136_v19 = vld [vmem:[#allocation5 + $0x88] sm:$0xf0]  ;;  %v1259_v21 = vor.u32 %v1572_v7, %v1256_v9  ;;  %v1620_v24 = vld [vmem:[#allocation5 + $0x2f4] sm:$0xf]  ;;  %v1448_v25 = vld [vmem:[#allocation5 + $0x2f8] sm:$0xf0] }
  0x44   :  { %799 = vmatpush.bf16.msra.mxu2 %v1179_v18  ;;  %v1542_v18 = vld [vmem:[#allocation5 + $0x84] sm:$0xf]  ;;  %v86_v27 = vld [vmem:[#allocation2 + $0x28] sm:$0xff]  ;;  %v1376_v33 = vld [vmem:[#allocation5 + $0x268] sm:$0xf0] }
  0x45   :  { %787 = vmatpush.bf16.msrb.mxu3 %v1107_v22  ;;  %v1387_v22 = vor.u32 %v1604_v10, %v1384_v11  ;;  %v1570_v28 = vld [vmem:[#allocation5 + $0x164] sm:$0xf]  ;;  %v1139_v31 = vor.u32 %v1542_v18, %v1136_v19  ;;  %v1851_v37 = vpack.c.bf16 %v86_v27, %v86_v27  ;;  %v1312_v39 = vld [vmem:[#allocation5 + $0x1e8] sm:$0xf0]  ;;  %v1240_v45 = vld [vmem:[#allocation5 + $0x158] sm:$0xf0] }
  0x46   :  { %761 = vmatpush.bf16.msrb.mxu1 %v1423_v29  ;;  %v1248_v29 = vld [vmem:[#allocation5 + $0x168] sm:$0xf0]  ;;  %v1602_v32 = vld [vmem:[#allocation5 + $0x264] sm:$0xf]  ;;  %v1600_v46 = vld [vmem:[#allocation5 + $0x254] sm:$0xf] }
  0x47   :  { %749 = vmatpush.bf16.msrb.mxu0 %v1351_v34  ;;  %1460 = vmatmul.msk.bf16.vlgmr.msrb.gmra.mxu2 %vm689_vm0, %v1845_v43  ;;  %v1323_v34 = vor.u32 %v1588_v20, %v1320_v23  ;;  %v1586_v36 = vld [vmem:[#allocation5 + $0x1e4] sm:$0xf]  ;;  %v1251_v38 = vor.u32 %v1570_v28, %v1248_v29  ;;  %v1440_v41 = vld [vmem:[#allocation5 + $0x2e8] sm:$0xf0]  ;;  %v1584_v50 = vld [vmem:[#allocation5 + $0x1d4] sm:$0xf] }
  0x48   :  { %800 = vmatpush.bf16.msra.mxu2 %v1171_v30  ;;  %v1849_v30 = vpack.c.bf16 %v85_v15, %v85_v15  ;;  %v1618_v40 = vld [vmem:[#allocation5 + $0x2e4] sm:$0xf]  ;;  %v1304_v53 = vld [vmem:[#allocation5 + $0x1d8] sm:$0xf0]  ;;  %v1616_v54 = vld [vmem:[#allocation5 + $0x2d4] sm:$0xf] }
  0x49   :  { %788 = vmatpush.bf16.msrb.mxu3 %v1099_v35  ;;  %v1451_v35 = vor.u32 %v1620_v24, %v1448_v25  ;;  %v1443_v49 = vor.u32 %v1618_v40, %v1440_v41  ;;  %v1432_v55 = vld [vmem:[#allocation5 + $0x2d8] sm:$0xf0]  ;;  %v1232_v59 = vld [vmem:[#allocation5 + $0x148] sm:$0xf0]  ;;  %v1598_v60 = vld [vmem:[#allocation5 + $0x244] sm:$0xf] }
  0x4a   :  { %762 = vmatpush.bf16.msrb.mxu1 %v1415_v42  ;;  %v1379_v42 = vor.u32 %v1602_v32, %v1376_v33  ;;  %v1360_v61 = vld [vmem:[#allocation5 + $0x248] sm:$0xf0]  ;;  %v1582_v0 = vld [vmem:[#allocation5 + $0x1c4] sm:$0xf]  ;;  %v1224_v9 = vld [vmem:[#allocation5 + $0x138] sm:$0xf0] }
  0x4b   :  { %750 = vmatpush.bf16.msrb.mxu0 %v1343_v47  ;;  %v1368_v47 = vld [vmem:[#allocation5 + $0x258] sm:$0xf0]  ;;  %v1296_v2 = vld [vmem:[#allocation5 + $0x1c8] sm:$0xf0]  ;;  %v1614_v5 = vld [vmem:[#allocation5 + $0x2c4] sm:$0xf]  ;;  %v1363_v7 = vor.u32 %v1598_v60, %v1360_v61 }
  0x4c   :  { %801 = vmatpush.bf16.msra.mxu2 %v1163_v44  ;;  %v1568_v44 = vld [vmem:[#allocation5 + $0x154] sm:$0xf]  ;;  %v1424_v6 = vld [vmem:[#allocation5 + $0x2c8] sm:$0xf0]  ;;  %v1299_v11 = vor.u32 %v1582_v0, %v1296_v2  ;;  %v1288_v14 = vld [vmem:[#allocation5 + $0x1b8] sm:$0xf0] }
  0x4d   :  { %789 = vmatpush.bf16.msrb.mxu3 %v1091_v48  ;;  %v1315_v48 = vor.u32 %v1586_v36, %v1312_v39  ;;  %v1243_v52 = vor.u32 %v1568_v44, %v1240_v45  ;;  %v1596_v10 = vld [vmem:[#allocation5 + $0x234] sm:$0xf]  ;;  %v1562_v18 = vld [vmem:[#allocation5 + $0x124] sm:$0xf]  ;;  %v1216_v19 = vld [vmem:[#allocation5 + $0x128] sm:$0xf0] }
  0x4e   :  { %763 = vmatpush.bf16.msrb.mxu1 %v1407_v56  ;;  %v1371_v56 = vor.u32 %v1600_v46, %v1368_v47  ;;  %v1612_v15 = vld [vmem:[#allocation5 + $0x2b4] sm:$0xf]  ;;  %v1594_v20 = vld [vmem:[#allocation5 + $0x224] sm:$0xf]  ;;  %v1219_v25 = vor.u32 %v1562_v18, %v1216_v19  ;;  %v1408_v28 = vld [vmem:[#allocation5 + $0x2a8] sm:$0xf0] }
  0x4f   :  { %751 = vmatpush.bf16.msrb.mxu0 %v1335_v62  ;;  %v1307_v62 = vor.u32 %v1584_v50, %v1304_v53  ;;  %v1578_v24 = vld [vmem:[#allocation5 + $0x1a4] sm:$0xf]  ;;  %v1208_v32 = vld [vmem:[#allocation5 + $0x118] sm:$0xf0]  ;;  %v1592_v33 = vld [vmem:[#allocation5 + $0x214] sm:$0xf] }
  0x50   :  { %802 = vmatpush.bf16.msra.mxu2 %v1155_v57  ;;  %v1566_v57 = vld [vmem:[#allocation5 + $0x144] sm:$0xf]  ;;  %v1272_v40 = vld [vmem:[#allocation5 + $0x198] sm:$0xf0]  ;;  %v1608_v41 = vld [vmem:[#allocation5 + $0x294] sm:$0xf] }
  0x51   :  { %790 = vmatpush.bf16.msrb.mxu3 %v1083_v63  ;;  %v1435_v63 = vor.u32 %v1616_v54, %v1432_v55  ;;  %v1235_v1 = vor.u32 %v1566_v57, %v1232_v59  ;;  %v1610_v27 = vld [vmem:[#allocation5 + $0x2a4] sm:$0xf]  ;;  %v1200_v46 = vld [vmem:[#allocation5 + $0x108] sm:$0xf0]  ;;  %v1629_v2 = vld [vmem:[#allocation8 + $0x28] sm:$0xff] }
  0x52   :  { %764 = vmatpush.bf16.msrb.mxu1 %v1399_v8  ;;  %v1564_v8 = vld [vmem:[#allocation5 + $0x134] sm:$0xf]  ;;  %v1411_v36 = vor.u32 %v1610_v27, %v1408_v28  ;;  %v1558_v45 = vld [vmem:[#allocation5 + $0x104] sm:$0xf]  ;;  %v1456_v50 = vld [vmem:[#allocation5 + $0x308] sm:$0xf0] }
  0x53   :  { %752 = vmatpush.bf16.msrb.mxu0 %v1327_v16  ;;  %v1227_v13 = vor.u32 %v1564_v8, %v1224_v9  ;;  %v1416_v16 = vld [vmem:[#allocation5 + $0x2b8] sm:$0xf0]  ;;  %v1590_v47 = vld [vmem:[#allocation5 + $0x204] sm:$0xf]  ;;  %v1203_v54 = vor.u32 %v1558_v45, %v1200_v46  ;;  %v1392_v60 = vld [vmem:[#allocation5 + $0x288] sm:$0xf0] }
  0x54   :  { %803 = vmatpush.bf16.msra.mxu2 %v1147_v12  ;;  %v1580_v12 = vld [vmem:[#allocation5 + $0x1b4] sm:$0xf]  ;;  %v1419_v23 = vor.u32 %v1612_v15, %v1416_v16  ;;  %v1574_v55 = vld [vmem:[#allocation5 + $0x184] sm:$0xf]  ;;  %v1631_v0 = vld [vmem:[#allocation8 + $0x38] sm:$0xff] }
  0x55   :  { %791 = vmatpush.bf16.msrb.mxu3 %v1075_v17  ;;  %v1606_v59 = vld [vmem:[#allocation5 + $0x284] sm:$0xf]  ;;  %v1637_v19 = vld [vmem:[#allocation8 + $0x68] sm:$0xff]  ;;  %v1635_v27 = vld [vmem:[#allocation8 + $0x58] sm:$0xff] }
  0x56   :  { %765 = vmatpush.bf16.msrb.mxu1 %v1391_v26  ;;  %753 = vmatmul.bf16.vlgmr.msrb.gmra.mxu0 %v1849_v30  ;;  %v1280_v26 = vld [vmem:[#allocation5 + $0x1a8] sm:$0xf0] }
  0x57   :  { %810 = vmatpush.bf16.msra.mxu0 %v1259_v21  ;;  %v1344_v21 = vld [vmem:[#allocation5 + $0x228] sm:$0xf0] }
  0x58   :  { %804 = vmatpush.bf16.msra.mxu2 %v1139_v31  ;;  %792 = vmatmul.bf16.vlgmr.msrb.gmra.mxu3 %v1835_v58  ;;  %v1427_v58 = vor.u32 %v1614_v5, %v1424_v6  ;;  %v1347_v29 = vor.u32 %v1594_v20, %v1344_v21  ;;  %v1560_v31 = vld [vmem:[#allocation5 + $0x114] sm:$0xf]  ;;  %v1627_v6 = vld [vmem:[#allocation8 + $0x18] sm:$0xff] }
  0x59   :  { %836 = vmatpush.bf16.msra.mxu3 %v1387_v22  ;;  %766 = vmatmul.bf16.vlgmr.msrb.gmra.mxu1 %v1851_v37  ;;  %v1291_v22 = vor.u32 %v1580_v12, %v1288_v14  ;;  %v1211_v39 = vor.u32 %v1560_v31, %v1208_v32  ;;  %v1628_v5 = vld [vmem:[#allocation8 + $0x20] sm:$0xff]  ;;  %v1634_v32 = vld [vmem:[#allocation8 + $0x50] sm:$0xff] }
  0x5a   :  { %823 = vmatpush.bf16.msra.mxu1 %v1323_v34  ;;  %v1336_v34 = vld [vmem:[#allocation5 + $0x218] sm:$0xf0] }
  0x5b   :  { %811 = vmatpush.bf16.msra.mxu0 %v1251_v38  ;;  %805 = vmatmul.bf16.vlgmr.msra.gmra.mxu2 %v1839_v4  ;;  %v1352_v4 = vld [vmem:[#allocation5 + $0x238] sm:$0xf0]  ;;  %v1576_v38 = vld [vmem:[#allocation5 + $0x194] sm:$0xf]  ;;  %v1339_v44 = vor.u32 %v1592_v33, %v1336_v34 }
  0x5c   :  { %849 = vmatpush.bf16.msrb.mxu2 %v1451_v35  ;;  %v1355_v17 = vor.u32 %v1596_v10, %v1352_v4  ;;  %v1283_v35 = vor.u32 %v1578_v24, %v1280_v26  ;;  %v1639_v4 = vld [vmem:[#allocation8 + $0x78] sm:$0xff] }
  0x5d   :  { %837 = vmatpush.bf16.msra.mxu3 %v1379_v42  ;;  %v1400_v42 = vld [vmem:[#allocation5 + $0x298] sm:$0xf0] }
  0x5e   :  { %824 = vmatpush.bf16.msra.mxu1 %v1315_v48  ;;  %v1328_v48 = vld [vmem:[#allocation5 + $0x208] sm:$0xf0]  ;;  %v1403_v53 = vor.u32 %v1608_v41, %v1400_v42 }
  0x5f   :  { %812 = vmatpush.bf16.msra.mxu0 %v1243_v52  ;;  %v1275_v52 = vor.u32 %v1576_v38, %v1272_v40  ;;  %v1331_v57 = vor.u32 %v1590_v47, %v1328_v48  ;;  %v1633_v38 = vld [vmem:[#allocation8 + $0x48] sm:$0xff] }
  0x60   :  { %850 = vmatpush.bf16.msrb.mxu2 %v1443_v49  ;;  %v1622_v49 = vld [vmem:[#allocation5 + $0x304] sm:$0xf] }
  0x61   :  { %838 = vmatpush.bf16.msra.mxu3 %v1371_v56  ;;  %v1264_v56 = vld [vmem:[#allocation5 + $0x188] sm:$0xf0]  ;;  %v1459_v61 = vor.u32 %v1622_v49, %v1456_v50 }
  0x62   :  { %825 = vmatpush.bf16.msra.mxu1 %v1307_v62  ;;  %v1267_v62 = vor.u32 %v1574_v55, %v1264_v56 }
  0x63   :  { %813 = vmatpush.bf16.msra.mxu0 %v1235_v1  ;;  %v1630_v1 = vld [vmem:[#allocation8 + $0x30] sm:$0xff] }
  0x64   :  { %851 = vmatpush.bf16.msrb.mxu2 %v1435_v63  ;;  %v1395_v63 = vor.u32 %v1606_v59, %v1392_v60 }
  0x65   :  { %839 = vmatpush.bf16.msra.mxu3 %v1363_v7 }
  0x66   :  { %826 = vmatpush.bf16.msra.mxu1 %v1299_v11 }
  0x67   :  { %814 = vmatpush.bf16.msra.mxu0 %v1227_v13  ;;  %v1638_v13 = vld [vmem:[#allocation8 + $0x70] sm:$0xff] }
  0x68   :  { %852 = vmatpush.bf16.msrb.mxu2 %v1427_v58 }
  0x69   :  { %840 = vmatpush.bf16.msra.mxu3 %v1355_v17 }
  0x6a   :  { %827 = vmatpush.bf16.msra.mxu1 %v1291_v22  ;;  %v1636_v22 = vld [vmem:[#allocation8 + $0x60] sm:$0xff] }
  0x6b   :  { %815 = vmatpush.bf16.msra.mxu0 %v1219_v25 }
  0x6c   :  { %853 = vmatpush.bf16.msrb.mxu2 %v1419_v23 }
  0x6d   :  { %841 = vmatpush.bf16.msra.mxu3 %v1347_v29 }
  0x6e   :  { %828 = vmatpush.bf16.msra.mxu1 %v1283_v35 }
  0x6f   :  { %816 = vmatpush.bf16.msra.mxu0 %v1211_v39  ;;  %v1632_v39 = vld [vmem:[#allocation8 + $0x40] sm:$0xff] }
  0x70   :  { %854 = vmatpush.bf16.msrb.mxu2 %v1411_v36 }
  0x71   :  { %842 = vmatpush.bf16.msra.mxu3 %v1339_v44 }
  0x72   :  { %829 = vmatpush.bf16.msra.mxu1 %v1275_v52 }
  0x73   :  { %817 = vmatpush.bf16.msra.mxu0 %v1203_v54 }
  0x74   :  { %855 = vmatpush.bf16.msrb.mxu2 %v1403_v53 }
  0x75   :  { %843 = vmatpush.bf16.msra.mxu3 %v1331_v57 }
  0x76   :  { %830 = vmatpush.bf16.msra.mxu1 %v1267_v62  ;;  %818 = vmatmul.bf16.vlgmr.msra.gmra.mxu0 %v1833_v51  ;;  %v1626_v51 = vld [vmem:[#allocation8 + $0x10] sm:$0xff] }
  0x77   :  { %869 = vmatpush.bf16.msrb.mxu0 %v1459_v61 }
  0x78   :  { %844 = vmatmul.bf16.vlgmr.msra.gmra.mxu3 %v1849_v30  ;;  %856 = vmatpush.bf16.msrb.mxu2 %v1395_v63  ;;  %v1625_v30 = vld [vmem:[#allocation8 + $0x8] sm:$0xff] }
  0x79   :  { %831 = vmatmul.bf16.vlgmr.msra.gmra.mxu1 %v1837_v3  ;;  %1024 = vmatpush.bf16.msrb.mxu3 %v1639_v4 }
  0x7a   :  { %1011 = vmatpush.bf16.msrb.mxu1 %v1631_v0 }
  0x7b   :  { %857 = vmatmul.bf16.vlgmr.msrb.gmra.mxu2 %v1851_v37  ;;  %v1624_v37 = vld [vmem:[#allocation8] sm:$0xff] }
  0x7d   :  { %1025 = vmatpush.bf16.msrb.mxu3 %v1638_v13 }
  0x7e   :  { %1012 = vmatpush.bf16.msrb.mxu1 %v1630_v1 }
  0x81   :  { %1026 = vmatpush.bf16.msrb.mxu3 %v1637_v19 }
  0x82   :  { %1013 = vmatpush.bf16.msrb.mxu1 %v1629_v2 }
  0x85   :  { %1027 = vmatpush.bf16.msrb.mxu3 %v1636_v22 }
  0x86   :  { %1461 = vmatmul.msk.bf16.vlgmr.msrb.gmra.mxu0 %vm689_vm0, %v1845_v43  ;;  %1014 = vmatpush.bf16.msrb.mxu1 %v1628_v5  ;;  %v193_v43 = vld [vmem:[#allocation7] sm:$0x3]  ;;  %v1649_v5 = vld [vmem:[%s1873_s4] ss:$0 sm:$0xff]  ;;  %s1056_s4 = sshll.u32 %s1874_s5, 4  ;;  %s1057_s4 = int_to_ptr.hbm [resolvable:$true] %s1056_s4 }
  0x87   :  { %v195_v58 = vperm.slane %v193_v43, 0  ;;  %v196_v42 = vperm.slane %v193_v43, 1 }
  0x89   :  { %1028 = vmatpush.bf16.msrb.mxu3 %v1635_v27 }
  0x8a   :  { %1015 = vmatpush.bf16.msrb.mxu1 %v1627_v6 }
  0x8d   :  { %1029 = vmatpush.bf16.msrb.mxu3 %v1634_v32 }
  0x8e   :  { %1016 = vmatpush.bf16.msrb.mxu1 %v1626_v51 }
  0x91   :  { %1030 = vmatpush.bf16.msrb.mxu3 %v1633_v38 }
  0x92   :  { %1017 = vmatpush.bf16.msrb.mxu1 %v1625_v30 }
  0x95   :  { %1031 = vmatpush.bf16.msrb.mxu3 %v1632_v39 }
  0x96   :  { %1018 = vmatpush.bf16.msrb.mxu1 %v1624_v37 }
  0xb3   :  { %v702_v7 = vpop.f32.mrf.mxu0 }
  0xb4   :  { %v703_v14 = vadd.f32 %v702_v7, %v195_v58 }
  0xb6   :  { %v715_v3 = vpop.f32.mrf.mxu1 }
  0xb7   :  { %v716_v16 = vadd.f32 %v715_v3, %v703_v14 }
  0xba   :  { %v728_v8 = vpop.f32.mrf.mxu2 }
  0xbb   :  { %v741_v9 = vpop.f32.mrf.mxu3  ;;  %v704_v10 = vpop.f32.mrf.mxu0  ;;  %v729_v18 = vadd.f32 %v728_v8, %v716_v16 }
  0xbd   :  { %v742_v20 = vadd.f32 %v741_v9, %v729_v18 }
  0xbe   :  { %v717_v11 = vpop.f32.mrf.mxu1 }
  0xc2   :  { %v730_v12 = vpop.f32.mrf.mxu2 }
  0xc3   :  { %v743_v15 = vpop.f32.mrf.mxu3 }
  0xca   :  { %v780_v17 = vpop.f32.mrf.mxu2 }
  0xd2   :  { %v782_v24 = vpop.f32.mrf.mxu2 }
  0xd3   :  { %v754_v21 = vpop.f32.mrf.mxu0 }
  0xd4   :  { %v755_v23 = vadd.f32 %v754_v21, %v742_v20 }
  0xd6   :  { %v767_v25 = vpop.f32.mrf.mxu1 }
  0xd7   :  { %v768_v26 = vadd.f32 %v767_v25, %v755_v23 }
  0xd9   :  { %v781_v28 = vadd.f32 %v780_v17, %v768_v26 }
  0xdb   :  { %v875_v29 = vmax.f32 %v781_v28, 0.0  ;;  %v756_v31 = vpop.f32.mrf.mxu0  ;;  %v793_v35 = vpop.f32.mrf.mxu3 }
  0xdc   :  { %v794_v44 = vadd.f32 %v793_v35, %v196_v42 }
  0xdd   :  { %v877_v33 = vpack.c.bf16 %v875_v29, %v875_v29 }
  0xde   :  { %v806_v34 = vpop.f32.mrf.mxu2  ;;  %v769_v36 = vpop.f32.mrf.mxu1 }
  0xdf   :  { %1019 = vmatmul.bf16.vlgmr.msrb.gmra.mxu1 %v877_v33  ;;  %v807_v46 = vadd.f32 %v806_v34, %v794_v44 }
  0xe3   :  { %v795_v41 = vpop.f32.mrf.mxu3 }
  0xe6   :  { %v808_v40 = vpop.f32.mrf.mxu2 }
  0xf3   :  { %v819_v45 = vpop.f32.mrf.mxu0 }
  0xf4   :  { %v820_v48 = vadd.f32 %v819_v45, %v807_v46 }
  0xf6   :  { %v832_v47 = vpop.f32.mrf.mxu1 }
  0xf7   :  { %v833_v52 = vadd.f32 %v832_v47, %v820_v48 }
  0xfb   :  { %v845_v49 = vpop.f32.mrf.mxu3  ;;  %v821_v50 = vpop.f32.mrf.mxu0 }
  0xfc   :  { %v846_v54 = vadd.f32 %v845_v49, %v833_v52 }
  0xfe   :  { %v858_v53 = vpop.f32.mrf.mxu2  ;;  %v834_v55 = vpop.f32.mrf.mxu1 }
  0xff   :  { %v859_v56 = vadd.f32 %v858_v53, %v846_v54 }
 0x103   :  { %v847_v57 = vpop.f32.mrf.mxu3  ;;  %v871_v59 = vpop.f32.mrf.mxu0 }
 0x104   :  { %v872_v60 = vadd.f32 %v871_v59, %v859_v56 }
 0x106   :  { %v860_v61 = vpop.f32.mrf.mxu2  ;;  %v876_v62 = vmax.f32 %v872_v60, 0.0 }
 0x108   :  { %v878_v63 = vpack.c.bf16 %v876_v62, %v876_v62 }
 0x10a   :  { %1032 = vmatmul.bf16.vlgmr.msrb.gmra.mxu3 %v878_v63 }
 0x10b   :  { %v873_v0 = vpop.f32.mrf.mxu0 }
 0x15c   :  { %v1020_v1 = vpop.f32.mrf.mxu1 }
 0x15d   :  { %v1021_v6 = vadd.f32 %v1649_v5, %v1020_v1 }
 0x164   :  { %v1022_v2 = vpop.f32.mrf.mxu1 }
 0x18d   :  { %v1033_v51 = vpop.f32.mrf.mxu3 }
 0x18e   :  { %v1034_v30 = vadd.f32 %v1033_v51, %v1021_v6 }
 0x190   :  { %1037 = vmax.xlane.f32.xlu0 %v1034_v30 }
 0x195   :  { %v1035_v7 = vpop.f32.mrf.mxu3 }
 0x203   :  { %v1038_v3 = vpop.xlane.xlu0 %1037 }
 0x204   :  { %v1039_v37 = vsub.f32 %v1034_v30, %v1038_v3 }
 0x206   :  { %v1040_v8 = vmul.f32 1.442695, %v1039_v37 }
 0x208   :  { %1650 = vpow2.f32 %v1040_v8 }
 0x20e   :  { %v1651_v43 = vpop.eup %1650 }
 0x20f   :  { %1042 = vadd.xlane.f32.xlu0 %v1651_v43 }
 0x282   :  { %v1043_v9 = vpop.xlane.xlu0 %1042 }
 0x283   :  { %1652 = vlog2.f32 %v1043_v9 }
 0x289   :  { %v1653_v10 = vpop.eup %1652 }
 0x28a   :  { %v1045_v4 = vmul.f32 0.6931472, %v1653_v10 }
 0x28c   :  { %v1046_v11 = vsub.f32 %v1039_v37, %v1045_v4 }
 0x28e   :  { %v1047_v58 = vpack.c.bf16 %v1046_v11, %v1046_v11 }
 0x290   :  { %1048 = vst [vmem:[#allocation10] sm:$0xf] %v1047_v58 }
 0x291   :  { %1059 = dma.vmem_to_hbm [thread:$0]  %s1055_s16, 64, %s1057_s4, [#allocation4]  }
 0x292   :  { %1780 = dma.done.wait [#allocation4], 64  }
 0x293   :  { %1781 = vsyncadd [#allocation4], 4294967232 }
 0x294   :  { %1064 = vsyncpa [#allocation3], 1 }
 0x295   :  { %1065 = vsyncpa [#allocation6], 1 }
 0x296   :  { %1066 = vsyncpa [#allocation9], 1 }
 0x297   :  { %1067 = vsyncpa [#allocation4], 1 }

</bundles_post_ra>
